<compile_context>
chip_gen: v7x
topology: tpu7x:2x2x1
jax: 0.10.0
libtpu: 0.0.40
codegen_flags: <defaults>
</compile_context>

<pallas_src>
import jax
import jax.numpy as jnp
from jax.experimental import pallas as pl
from jax.experimental.pallas import tpu as pltpu


def ballai_kernel(x_ref,
                  w1_ref, b1_ref,
                  w2_ref, b2_ref,
                  w3_ref, b3_ref,
                  w4t_ref, b4_ref,
                  out_ref):
    # x_ref: [12, T] f32 (features on sublanes, batch on the 128-lane axis).

    def layer(w_ref, b_ref, h):
        # MXU matmul with f32 accumulation; bias-add + ReLU in bf16 so the
        # big inter-layer temporaries are half-width (bf16 VALU on v6e/v7x).
        acc = jnp.dot(w_ref[...], h, preferred_element_type=jnp.float32)
        return jnp.maximum(acc.astype(jnp.bfloat16) + b_ref[...], 0)

    h = layer(w1_ref, b1_ref, x_ref[...])   # [64,  T] bf16 (f32xf32 MXU, K=12)
    h = layer(w2_ref, b2_ref, h)             # [128, T] bf16
    h = layer(w3_ref, b3_ref, h)             # [64,  T] bf16

    # Layer 4 ([2, 64] weight) off the MXU: two sublane-broadcast multiplies
    # (VPU) + sublane reductions (XLU).  In an MXU-bound kernel these slots
    # have slack, so this reclaims the layer-4 MXU stream.
    w4t = w4t_ref[...]                       # [64, 2] f32 (features on sublanes)
    b4 = b4_ref[...]                         # [2, 1]  f32
    l0 = jnp.sum(w4t[:, 0:1] * h, axis=0, keepdims=True) + b4[0:1, :]   # [1, T]
    l1 = jnp.sum(w4t[:, 1:2] * h, axis=0, keepdims=True) + b4[1:2, :]   # [1, T]

    # 2-class log_softmax with explicit two-row math: no cross-lane reduce
    # over a nearly-empty vreg; exp/log run on the EUP slot.
    m = jnp.maximum(l0, l1)
    lse = m + jnp.log(jnp.exp(l0 - m) + jnp.exp(l1 - m))                # [1, T]

    # Packed output block: rows 0:2 = logits, rows 2:4 = log_probs.
    out_ref[...] = jnp.concatenate([l0, l1, l0 - lse, l1 - lse],
                                   axis=0).astype(out_ref.dtype)        # [4, T]


def _round_up(n, m):
    return ((n + m - 1) // m) * m


def ballai_forward(x, params, tile_b=4096):
    """x: [B, 12] f32. Returns (logits [B, 2], log_probs [B, 2]) matching BallAI."""
    B = x.shape[0]
    (w1, b1), (w2, b2), (w3, b3), (w4, b4) = params

    # Lane-dense batch tile, capped at `tile_b` (4096 default fits comfortably
    # in a 32 MiB scoped VMEM budget on every TPU generation incl. v7x).
    tile_b = _round_up(tile_b, 128)
    if B <= tile_b:
        # Guarantee >= 2 grid steps so both v7x TensorCores get a shard.
        tb = _round_up(pl.cdiv(B, 2), 128)
        n_steps = 2
    else:
        tb = tile_b
        n_steps = pl.cdiv(B, tb)
        n_steps += n_steps % 2            # even step count for 2-TC sharding
    b_pad = n_steps * tb
    grid = (n_steps,)

    # Features-on-sublanes / batch-on-lanes layout; single pad on the
    # already-transposed cast (no zeros().at[].set() extra pass).
    # TODO(synk): if the producer can emit x as [12, B] (and accept [2, B]
    # outputs) the wrapper-side transposes disappear entirely.
    x_t = jnp.pad(x.astype(jnp.float32).T, ((0, 0), (0, b_pad - B)))

    # Weights in PyTorch layout [out, in]; layer 1 kept f32 for accuracy,
    # layers 2-3 bf16 (MXU-native), layer 4 pre-transposed to [64, 2] f32 for
    # the VPU/XLU path.  Biases for layers 1-3 as bf16 [out, 1] columns.
    bf = lambda a: a.astype(jnp.bfloat16)
    bcol_bf = lambda b: b.reshape(-1, 1).astype(jnp.bfloat16)
    ws = (w1.astype(jnp.float32), bcol_bf(b1),
          bf(w2), bcol_bf(b2),
          bf(w3), bcol_bf(b3),
          w4.T.astype(jnp.float32),
          b4.reshape(-1, 1).astype(jnp.float32))

    # Constant index_maps: the ~70 KB of weights stay VMEM-resident across the
    # whole grid (no refetch).  Default double-buffering left alone.
    resident = lambda a: pl.BlockSpec(a.shape, lambda i: (0, 0))
    in_specs = ([pl.BlockSpec((12, tb), lambda i: (0, i))]
                + [resident(a) for a in ws])
    out_specs = pl.BlockSpec((4, tb), lambda i: (0, i))

    flops = 2 * b_pad * (12 * 64 + 64 * 128 + 128 * 64 + 64 * 2)
    bytes_accessed = (x_t.size * x_t.dtype.itemsize
                      + sum(int(a.size) * a.dtype.itemsize for a in ws)
                      + 4 * b_pad * 4)
    cost = pl.CostEstimate(flops=flops,
                           transcendentals=3 * b_pad,
                           bytes_accessed=bytes_accessed)

    out = pl.pallas_call(
        ballai_kernel,
        out_shape=jax.ShapeDtypeStruct((4, b_pad), jnp.float32),
        grid=grid,
        in_specs=in_specs,
        out_specs=out_specs,
        compiler_params=pltpu.CompilerParams(
            dimension_semantics=("parallel",),
            vmem_limit_bytes=32 * 1024 * 1024),
        cost_estimate=cost,
    )(x_t, *ws)

    logits = out[0:2, :B].T
    log_probs = out[2:4, :B].T
    return logits, log_probs


def init_linear(key, fan_in, fan_out):
    """Deterministic init mimicking PyTorch nn.Linear (uniform +/- 1/sqrt(fan_in))."""
    kw, kb = jax.random.split(key)
    bound = 1.0 / jnp.sqrt(jnp.float32(fan_in))
    w = jax.random.uniform(kw, (fan_out, fan_in), jnp.float32, -bound, bound)
    b = jax.random.uniform(kb, (fan_out,), jnp.float32, -bound, bound)
    return w, b


def reference_forward(x, params):
    """Pure-JAX f32 reference matching the PyTorch module."""
    (w1, b1), (w2, b2), (w3, b3), (w4, b4) = params
    h = jnp.maximum(x @ w1.T + b1, 0.0)
    h = jnp.maximum(h @ w2.T + b2, 0.0)
    h = jnp.maximum(h @ w3.T + b3, 0.0)
    logits = h @ w4.T + b4
    return logits, jax.nn.log_softmax(logits, axis=-1)


if __name__ == "__main__":
    key = jax.random.PRNGKey(0)
    kx, k1, k2, k3, k4 = jax.random.split(key, 5)

    B = 8  # small batch for the demo; kernel tiles/pads the batch onto lanes
    x = jax.random.normal(kx, (B, 12), jnp.float32)

    params = (
        init_linear(k1, 12, 64),
        init_linear(k2, 64, 128),
        init_linear(k3, 128, 64),
        init_linear(k4, 64, 2),
    )

    logits, log_probs = ballai_forward(x, params)
    jax.block_until_ready((logits, log_probs))

    ref_logits, ref_logprobs = reference_forward(x, params)
    # bf16 matmul operands / bf16 elementwise tail (f32 accumulate, f32 layer 1
    # and layer 4) => loose tolerance vs the f32 reference.
    assert jnp.allclose(logits, ref_logits, atol=5e-2, rtol=5e-2)
    assert jnp.allclose(log_probs, ref_logprobs, atol=5e-2, rtol=5e-2)
    # Tight self-consistency: log_probs is log_softmax of the kernel's own
    # logits (the whole tail past layer 3 is f32).
    assert jnp.allclose(log_probs, jax.nn.log_softmax(logits, axis=-1),
                        atol=1e-5, rtol=1e-5)

    print("KERNEL_OK")
</pallas_src>

<mosaic_0001>
module attributes {stable_mosaic.version = 11 : i64} {
  func.func @ballai_kernel(%arg0: i32, %arg1: memref<12x128xf32, #tpu.memory_space<vmem>>, %arg2: memref<64x12xf32, #tpu.memory_space<vmem>>, %arg3: memref<64x1xbf16, #tpu.memory_space<vmem>>, %arg4: memref<128x64xbf16, #tpu.memory_space<vmem>>, %arg5: memref<128x1xbf16, #tpu.memory_space<vmem>>, %arg6: memref<64x128xbf16, #tpu.memory_space<vmem>>, %arg7: memref<64x1xbf16, #tpu.memory_space<vmem>>, %arg8: memref<64x2xf32, #tpu.memory_space<vmem>>, %arg9: memref<2x1xf32, #tpu.memory_space<vmem>>, %arg10: memref<4x128xf32, #tpu.memory_space<vmem>>) attributes {dimension_semantics = [#tpu.dimension_semantics<parallel>], iteration_bounds = array<i64: 2>, scalar_prefetch = 0 : i64, scratch_operands = 0 : i64, tpu.core_type = #tpu.core_type<tc>, window_params = [{transform_indices = @transform_0, window_bounds = array<i64: 12, 128>}, {pipeline_mode = #tpu.pipeline_mode<synchronous>, transform_indices = @transform_1, window_bounds = array<i64: 64, 12>}, {pipeline_mode = #tpu.pipeline_mode<synchronous>, transform_indices = @transform_2, window_bounds = array<i64: 64, 1>}, {pipeline_mode = #tpu.pipeline_mode<synchronous>, transform_indices = @transform_3, window_bounds = array<i64: 128, 64>}, {pipeline_mode = #tpu.pipeline_mode<synchronous>, transform_indices = @transform_4, window_bounds = array<i64: 128, 1>}, {pipeline_mode = #tpu.pipeline_mode<synchronous>, transform_indices = @transform_5, window_bounds = array<i64: 64, 128>}, {pipeline_mode = #tpu.pipeline_mode<synchronous>, transform_indices = @transform_6, window_bounds = array<i64: 64, 1>}, {pipeline_mode = #tpu.pipeline_mode<synchronous>, transform_indices = @transform_7, window_bounds = array<i64: 64, 2>}, {pipeline_mode = #tpu.pipeline_mode<synchronous>, transform_indices = @transform_8, window_bounds = array<i64: 2, 1>}, {transform_indices = @transform_9, window_bounds = array<i64: 4, 128>}]} {
    %c0 = arith.constant 0 : index
    %c0_0 = arith.constant 0 : index
    %0 = vector.load %arg1[%c0, %c0_0] : memref<12x128xf32, #tpu.memory_space<vmem>>, vector<12x128xf32>
    %c0_1 = arith.constant 0 : index
    %c0_2 = arith.constant 0 : index
    %1 = vector.load %arg2[%c0_1, %c0_2] : memref<64x12xf32, #tpu.memory_space<vmem>>, vector<64x12xf32>
    %cst = arith.constant dense<0.000000e+00> : vector<64x128xf32>
    %2 = tpu.matmul %1, %0, %cst {dimension_numbers = #tpu.dot_dimension_numbers<[1], [0], [0], [1], [0, 0, 1, 1], [], []>} : vector<64x12xf32>, vector<12x128xf32>, vector<64x128xf32> -> vector<64x128xf32>
    %3 = arith.truncf %2 : vector<64x128xf32> to vector<64x128xbf16>
    %c0_3 = arith.constant 0 : index
    %c0_4 = arith.constant 0 : index
    %4 = vector.load %arg3[%c0_3, %c0_4] : memref<64x1xbf16, #tpu.memory_space<vmem>>, vector<64x1xbf16>
    %5 = vector.broadcast %4 : vector<64x1xbf16> to vector<64x128xbf16>
    %6 = arith.addf %3, %5 : vector<64x128xbf16>
    %cst_5 = arith.constant 0.000000e+00 : bf16
    %7 = vector.broadcast %cst_5 : bf16 to vector<64x128xbf16>
    %8 = arith.maximumf %6, %7 : vector<64x128xbf16>
    %c0_6 = arith.constant 0 : index
    %c0_7 = arith.constant 0 : index
    %9 = vector.load %arg4[%c0_6, %c0_7] : memref<128x64xbf16, #tpu.memory_space<vmem>>, vector<128x64xbf16>
    %cst_8 = arith.constant dense<0.000000e+00> : vector<128x128xf32>
    %10 = tpu.matmul %9, %8, %cst_8 {dimension_numbers = #tpu.dot_dimension_numbers<[1], [0], [0], [1], [0, 0, 1, 1], [], []>} : vector<128x64xbf16>, vector<64x128xbf16>, vector<128x128xf32> -> vector<128x128xf32>
    %11 = arith.truncf %10 : vector<128x128xf32> to vector<128x128xbf16>
    %c0_9 = arith.constant 0 : index
    %c0_10 = arith.constant 0 : index
    %12 = vector.load %arg5[%c0_9, %c0_10] : memref<128x1xbf16, #tpu.memory_space<vmem>>, vector<128x1xbf16>
    %13 = vector.broadcast %12 : vector<128x1xbf16> to vector<128x128xbf16>
    %14 = arith.addf %11, %13 : vector<128x128xbf16>
    %cst_11 = arith.constant 0.000000e+00 : bf16
    %15 = vector.broadcast %cst_11 : bf16 to vector<128x128xbf16>
    %16 = arith.maximumf %14, %15 : vector<128x128xbf16>
    %c0_12 = arith.constant 0 : index
    %c0_13 = arith.constant 0 : index
    %17 = vector.load %arg6[%c0_12, %c0_13] : memref<64x128xbf16, #tpu.memory_space<vmem>>, vector<64x128xbf16>
    %cst_14 = arith.constant dense<0.000000e+00> : vector<64x128xf32>
    %18 = tpu.matmul %17, %16, %cst_14 {dimension_numbers = #tpu.dot_dimension_numbers<[1], [0], [0], [1], [0, 0, 1, 1], [], []>} : vector<64x128xbf16>, vector<128x128xbf16>, vector<64x128xf32> -> vector<64x128xf32>
    %19 = arith.truncf %18 : vector<64x128xf32> to vector<64x128xbf16>
    %c0_15 = arith.constant 0 : index
    %c0_16 = arith.constant 0 : index
    %20 = vector.load %arg7[%c0_15, %c0_16] : memref<64x1xbf16, #tpu.memory_space<vmem>>, vector<64x1xbf16>
    %21 = vector.broadcast %20 : vector<64x1xbf16> to vector<64x128xbf16>
    %22 = arith.addf %19, %21 : vector<64x128xbf16>
    %cst_17 = arith.constant 0.000000e+00 : bf16
    %23 = vector.broadcast %cst_17 : bf16 to vector<64x128xbf16>
    %24 = arith.maximumf %22, %23 : vector<64x128xbf16>
    %c0_18 = arith.constant 0 : index
    %c0_19 = arith.constant 0 : index
    %25 = vector.load %arg8[%c0_18, %c0_19] : memref<64x2xf32, #tpu.memory_space<vmem>>, vector<64x2xf32>
    %c0_20 = arith.constant 0 : index
    %c0_21 = arith.constant 0 : index
    %26 = vector.load %arg9[%c0_20, %c0_21] : memref<2x1xf32, #tpu.memory_space<vmem>>, vector<2x1xf32>
    %27 = vector.extract_strided_slice %25 {offsets = [0, 0], sizes = [64, 1], strides = [1, 1]} : vector<64x2xf32> to vector<64x1xf32>
    %28 = arith.extf %24 : vector<64x128xbf16> to vector<64x128xf32>
    %29 = vector.broadcast %27 : vector<64x1xf32> to vector<64x128xf32>
    %30 = arith.mulf %29, %28 : vector<64x128xf32>
    %cst_22 = arith.constant dense<0.000000e+00> : vector<128xf32>
    %31 = vector.multi_reduction <add>, %30, %cst_22 [0] : vector<64x128xf32> to vector<128xf32>
    %32 = vector.shape_cast %31 : vector<128xf32> to vector<1x128xf32>
    %33 = vector.extract_strided_slice %26 {offsets = [0, 0], sizes = [1, 1], strides = [1, 1]} : vector<2x1xf32> to vector<1x1xf32>
    %34 = vector.broadcast %33 : vector<1x1xf32> to vector<1x128xf32>
    %35 = arith.addf %32, %34 : vector<1x128xf32>
    %36 = vector.extract_strided_slice %25 {offsets = [0, 1], sizes = [64, 1], strides = [1, 1]} : vector<64x2xf32> to vector<64x1xf32>
    %37 = arith.extf %24 : vector<64x128xbf16> to vector<64x128xf32>
    %38 = vector.broadcast %36 : vector<64x1xf32> to vector<64x128xf32>
    %39 = arith.mulf %38, %37 : vector<64x128xf32>
    %cst_23 = arith.constant dense<0.000000e+00> : vector<128xf32>
    %40 = vector.multi_reduction <add>, %39, %cst_23 [0] : vector<64x128xf32> to vector<128xf32>
    %41 = vector.shape_cast %40 : vector<128xf32> to vector<1x128xf32>
    %42 = vector.extract_strided_slice %26 {offsets = [1, 0], sizes = [1, 1], strides = [1, 1]} : vector<2x1xf32> to vector<1x1xf32>
    %43 = vector.broadcast %42 : vector<1x1xf32> to vector<1x128xf32>
    %44 = arith.addf %41, %43 : vector<1x128xf32>
    %45 = arith.maximumf %35, %44 : vector<1x128xf32>
    %46 = arith.subf %35, %45 : vector<1x128xf32>
    %47 = math.exp %46 : vector<1x128xf32>
    %48 = arith.subf %44, %45 : vector<1x128xf32>
    %49 = math.exp %48 : vector<1x128xf32>
    %50 = arith.addf %47, %49 : vector<1x128xf32>
    %51 = math.log %50 : vector<1x128xf32>
    %52 = arith.addf %45, %51 : vector<1x128xf32>
    %53 = arith.subf %35, %52 : vector<1x128xf32>
    %54 = arith.subf %44, %52 : vector<1x128xf32>
    %55 = tpu.concatenate %35, %44, %53, %54 in 0 : vector<1x128xf32>, vector<1x128xf32>, vector<1x128xf32>, vector<1x128xf32> -> vector<4x128xf32>
    %c0_24 = arith.constant 0 : index
    %c0_25 = arith.constant 0 : index
    %56 = vector.load %arg10[%c0_24, %c0_25] : memref<4x128xf32, #tpu.memory_space<vmem>>, vector<4x128xf32>
    tpu.vector_store %arg10[%c0_24, %c0_25], %55 {strides = array<i32>} : memref<4x128xf32, #tpu.memory_space<vmem>>, vector<4x128xf32>,
    return
  }
  func.func @transform_0(%arg0: i32) -> (i32, i32) {
    %c0_i32 = arith.constant 0 : i32
    %c0_i32_0 = arith.constant 0 : i32
    return %c0_i32, %arg0 : i32, i32
  }
  func.func @transform_1(%arg0: i32) -> (i32, i32) {
    %c0_i32 = arith.constant 0 : i32
    %c0_i32_0 = arith.constant 0 : i32
    %c0_i32_1 = arith.constant 0 : i32
    return %c0_i32, %c0_i32_0 : i32, i32
  }
  func.func @transform_2(%arg0: i32) -> (i32, i32) {
    %c0_i32 = arith.constant 0 : i32
    %c0_i32_0 = arith.constant 0 : i32
    %c0_i32_1 = arith.constant 0 : i32
    return %c0_i32, %c0_i32_0 : i32, i32
  }
  func.func @transform_3(%arg0: i32) -> (i32, i32) {
    %c0_i32 = arith.constant 0 : i32
    %c0_i32_0 = arith.constant 0 : i32
    %c0_i32_1 = arith.constant 0 : i32
    return %c0_i32, %c0_i32_0 : i32, i32
  }
  func.func @transform_4(%arg0: i32) -> (i32, i32) {
    %c0_i32 = arith.constant 0 : i32
    %c0_i32_0 = arith.constant 0 : i32
    %c0_i32_1 = arith.constant 0 : i32
    return %c0_i32, %c0_i32_0 : i32, i32
  }
  func.func @transform_5(%arg0: i32) -> (i32, i32) {
    %c0_i32 = arith.constant 0 : i32
    %c0_i32_0 = arith.constant 0 : i32
    %c0_i32_1 = arith.constant 0 : i32
    return %c0_i32, %c0_i32_0 : i32, i32
  }
  func.func @transform_6(%arg0: i32) -> (i32, i32) {
    %c0_i32 = arith.constant 0 : i32
    %c0_i32_0 = arith.constant 0 : i32
    %c0_i32_1 = arith.constant 0 : i32
    return %c0_i32, %c0_i32_0 : i32, i32
  }
  func.func @transform_7(%arg0: i32) -> (i32, i32) {
    %c0_i32 = arith.constant 0 : i32
    %c0_i32_0 = arith.constant 0 : i32
    %c0_i32_1 = arith.constant 0 : i32
    return %c0_i32, %c0_i32_0 : i32, i32
  }
  func.func @transform_8(%arg0: i32) -> (i32, i32) {
    %c0_i32 = arith.constant 0 : i32
    %c0_i32_0 = arith.constant 0 : i32
    %c0_i32_1 = arith.constant 0 : i32
    return %c0_i32, %c0_i32_0 : i32, i32
  }
  func.func @transform_9(%arg0: i32) -> (i32, i32) {
    %c0_i32 = arith.constant 0 : i32
    %c0_i32_0 = arith.constant 0 : i32
    return %c0_i32, %arg0 : i32, i32
  }
}

</mosaic_0001>

<bundles_post_ra>
// kernel: tpu_custom_call.1
= control target key start
LH: loop header
LB: loop body
LE: loop exit
PB: predicated region body
PF: predicated region fallthrough
CT: control target
= control target key end

     0   :  { %14 = vsyncpa [#allocation4], 0  ;;  %s2332_s0 = inlined_call_operand.vmem [shape: f32[12,256], index: 0, kind: input, shape index: {}]   ;;  %s2333_s1 = inlined_call_operand.vmem [shape: f32[64,12], index: 1, kind: input, shape index: {}]   ;;  %s2334_s2 = inlined_call_operand.vmem [shape: bf16[64,1], index: 2, kind: input, shape index: {}]   ;;  %s2335_s3 = inlined_call_operand.vmem [shape: bf16[128,64], index: 3, kind: input, shape index: {}]   ;;  %s2336_s4 = inlined_call_operand.vmem [shape: bf16[128,1], index: 4, kind: input, shape index: {}]   ;;  %s2337_s5 = inlined_call_operand.vmem [shape: bf16[64,128], index: 5, kind: input, shape index: {}]   ;;  %s2338_s6 = inlined_call_operand.vmem [shape: bf16[64,1], index: 6, kind: input, shape index: {}]   ;;  %s2339_s7 = inlined_call_operand.vmem [shape: f32[64,2], index: 7, kind: input, shape index: {}]   ;;  %s2340_s8 = inlined_call_operand.vmem [shape: f32[2,1], index: 8, kind: input, shape index: {}]   ;;  %s2341_s9 = inlined_call_operand.hbm [shape: f32[4,256], index: 9, kind: output, shape index: {}]  }
   0x1   :  { %16 = vsyncpa [#allocation4 + $0x1], 0  ;;  %s1958_s30 = smov 0   ;;  %s1960_s10 = smov 0  }
   0x2   :  { %s1962_s11 = smov 0   ;;  %s1964_s12 = smov 0  }
   0x3 LB: > { %s1603_s13 = sadd.s32 4294967295, %s1901_s12   ;;  %s1604_s14 = sadd.s32 4294967294, %s1901_s12   ;;  %s1901_s12 = sphi %s1964_s12, %s2347_s12   ;;  %s1897_s11 = sphi %s1962_s11, %s2346_s11   ;;  %s1893_s10 = sphi %s1960_s10, %s2345_s10   ;;  %s1889_s30 = sphi %s1958_s30, %s2344_s30  }
   0x4   : > { %s1981_s15 = sadd.s32 1, %s1901_s12   ;;  %s29_s16 = sadd.s32 1, %s1897_s11 }
   0x5   : > { %s26_s17 = ssub.s32 %s1901_s12, %s1981_s15  ;;  %p36_p0 = scmp.ne.s32.totalorder %s1897_s11, %s1893_s10 }
   0x6   : > { %p27_p1 = scmp.eq.s32.totalorder %s26_s17, 0  ;;  %p37_p2 = scmp.eq.s32.totalorder %s1901_s12, 0 }
   0x7   : > { %p234_p3 = scmp.eq.s32.totalorder %s1603_s13, 1  ;;  %p239_p4 = scmp.ne.s32.totalorder %s1893_s10, %s1889_s30 }
   0x8   : > { %s1994_s18 = scalar_select %p27_p1, %s1897_s11, %s29_s16  }
   0x9   : > { %p38_p5 = por %p37_p2, %p36_p0  ;;  %p1996_p6 = por %p234_p3, %p36_p0 }
   0xa   : > { %p240_p7 = scmp.eq.s32.totalorder %s1604_s14, 1  ;;  %p1606_p9 = scmp.ge.s32.totalorder %s1901_s12, 2 }
   0xc   : > { %p2000_p8 = por %p240_p7, %p239_p4  ;;  %280 = sbr.rel (%p1606_p9) target bundleno = 26 (0x1a), region = 48 }
  0x13   : > { %283 = sbr.rel (!%p38_p5) target bundleno = 26 (0x1a), region = 52  ;;  %s285_s21 = sand.u32 (%p38_p5), 1, %s1897_s11  }
  0x14   : > { %s1608_s22 = sshll.u32 (%p38_p5), %s1901_s12, 3  ;;  %s1607_s23 = sshll.u32 (%p38_p5), %s285_s21, 4 }
  0x15   : > { %s289_s26 = scalar_lea.vmem (%p38_p5), %s2332_s0, %s1608_s22  ;;  %s287_s27 = scalar_lea.vmem (%p38_p5), [#allocation2], %s1607_s23 }
  0x16   : > { %v319_v0 = vld [vmem:[%s289_s26] sm:$0xff] (%p38_p5)  ;;  %v321_v1 = vld [vmem:[%s289_s26 + $0x10] sm:$0xff] (%p38_p5) }
  0x17   : > { %320 = vst [vmem:[%s287_s27] sm:$0xff] (%p38_p5), %v319_v0  ;;  %322 = vst [vmem:[%s287_s27 + $0x8] sm:$0xff] (%p38_p5), %v321_v1 }
  0x1a PF: > { %p1609_p10 = scmp.ge.s32.totalorder %s1901_s12, 1  ;;  %p327_p11 = scmp.lt.s32.totalorder %s1901_s12, 3 }
  0x1c   : > { %p328_p12 = pnand %p1609_p10, %p327_p11 }
  0x1d   : > { %s2015_s28 = sand.u32 (!%p328_p12), 1, %s1893_s10   ;;  %vm405_vm0 = vcmask (!%p328_p12), 1043456   ;;  %v372_v2 = vld [vmem:[%s2333_s1] sm:$0xff] (!%p328_p12)  ;;  %vm380_vm1 = vcmask (!%p328_p12), 97280   ;;  %v1903_v3 = vmov (!%p328_p12), 0   ;;  %vm1904_vm2 = vmmov (!%p328_p12), 1  }
  0x1e   : > { %331 = sbr.rel (%p328_p12) target bundleno = 844 (0x34c), region = 90  ;;  %s1610_s16 = sshll.u32 (!%p328_p12), %s2015_s28, 4  ;;  %1699 = vmatprep.mubr.msk.f32.mxu0 (!%p328_p12), %vm380_vm1, %v372_v2  ;;  %1808 = vset.pattern.permute.xlu0 (!%p328_p12), %v1903_v3  ;;  %v518_v4 = vld [vmem:[%s2334_s2] sm:$0xf] (!%p328_p12)  ;;  %vm1760_vm3 = vmpackc.low (!%p328_p12), %vm405_vm0, %vm1904_vm2  ;;  %v519_v8 = vld [vmem:[%s2334_s2 + $0x4] sm:$0xf] (!%p328_p12)  ;;  %v534_v51 = vlaneseq (!%p328_p12) }
  0x1f   : > { %1809 = vset.pattern.permute.xlu1 (!%p328_p12), %v1903_v3  ;;  %s336_s22 = scalar_lea.vmem (!%p328_p12), [#allocation2], %s1610_s16  ;;  %528 = vperm.xlu0 (!%p328_p12), %1808, %v518_v4   ;;  %v520_v9 = vld [vmem:[%s2334_s2 + $0x8] sm:$0xf] (!%p328_p12)  ;;  %v521_v10 = vld [vmem:[%s2334_s2 + $0xc] sm:$0xf] (!%p328_p12)  ;;  %v374_v12 = vld [vmem:[%s2333_s1 + $0x10] sm:$0xff] (!%p328_p12) }
  0x20   : > { %v370_v5 = vld [vmem:[%s336_s22] sm:$0xff] (!%p328_p12)  ;;  %v371_v6 = vld [vmem:[%s336_s22 + $0x8] sm:$0xf] (!%p328_p12)  ;;  %552 = vperm.xlu1 (!%p328_p12), %1809, %v520_v9   ;;  %v525_v20 = vld [vmem:[%s2334_s2 + $0x1c] sm:$0xf] (!%p328_p12)  ;;  %vm710_vm4 = vcmask (!%p328_p12), 523264  }
  0x21   : > { %v1759_v7 = vpack.c.bf16 (!%p328_p12), %v371_v6, %v370_v5  ;;  %v373_v11 = vld [vmem:[%s2333_s1 + $0x8] sm:$0xff] (!%p328_p12)  ;;  %v522_v13 = vld [vmem:[%s2334_s2 + $0x10] sm:$0xf] (!%p328_p12)  ;;  %v523_v14 = vld [vmem:[%s2334_s2 + $0x14] sm:$0xf] (!%p328_p12)  ;;  %v535_v53 = vshrl.u32 (!%p328_p12), %v534_v51, 7 }
  0x22   : > { %v375_v15 = vld [vmem:[%s2333_s1 + $0x18] sm:$0xff] (!%p328_p12)  ;;  %v376_v16 = vld [vmem:[%s2333_s1 + $0x20] sm:$0xff] (!%p328_p12)  ;;  %v377_v18 = vld [vmem:[%s2333_s1 + $0x28] sm:$0xff] (!%p328_p12)  ;;  %v1905_v49 = vmov (!%p328_p12), 839922192   ;;  %vm1518_vm5 = vcmask (!%p328_p12), 1040384  }
  0x23   : > { %1761 = vmatprep.subr.msk.bf16.mxu0 (!%p328_p12), %vm1760_vm3, %v1759_v7  ;;  %540 = vperm.xlu0 (!%p328_p12), %1808, %v519_v8   ;;  %v524_v17 = vld [vmem:[%s2334_s2 + $0x18] sm:$0xf] (!%p328_p12)  ;;  %v378_v19 = vld [vmem:[%s2333_s1 + $0x30] sm:$0xff] (!%p328_p12)  ;;  %v840_v21 = vld [vmem:[%s2336_s4] sm:$0xf] (!%p328_p12)  ;;  %v532_v50 = vunpack.c.l.s4 (!%p328_p12), %v1905_v49  ;;  %s1611_s17 = sshll.u32 (!%p328_p12), %s2015_s28, 2 }
  0x24   : > { %1764 = vmatpush3.bf16.msk.msra.mxu0 (!%p328_p12), %vm1760_vm3, %v1759_v7  ;;  %564 = vperm.xlu1 (!%p328_p12), %1809, %v521_v10   ;;  %v841_v22 = vld [vmem:[%s2336_s4 + $0x4] sm:$0xf] (!%p328_p12)  ;;  %v379_v23 = vld [vmem:[%s2333_s1 + $0x38] sm:$0xff] (!%p328_p12)  ;;  %v842_v24 = vld [vmem:[%s2336_s4 + $0x8] sm:$0xf] (!%p328_p12)  ;;  %vm1520_vm6 = vcmask (!%p328_p12), 1041408  }
  0x25   : > { %v843_v25 = vld [vmem:[%s2336_s4 + $0xc] sm:$0xf]  ;;  %v844_v26 = vld [vmem:[%s2336_s4 + $0x10] sm:$0xf]  ;;  %v845_v27 = vld [vmem:[%s2336_s4 + $0x14] sm:$0xf]  ;;  %v533_v52 = vunpack.c.0.s8 %v532_v50 }
  0x26   : > { %v846_v28 = vld [vmem:[%s2336_s4 + $0x18] sm:$0xf]  ;;  %v847_v29 = vld [vmem:[%s2336_s4 + $0x1c] sm:$0xf]  ;;  %v848_v30 = vld [vmem:[%s2336_s4 + $0x20] sm:$0xf] }
  0x27   : > { %1700 = vmatmul.mubr.msk.f32.vlgmr.msra.gmra.mrb[0].mxu0 %vm380_vm1, %v373_v11  ;;  %576 = vperm.xlu0 %1808, %v522_v13   ;;  %v849_v31 = vld [vmem:[%s2336_s4 + $0x24] sm:$0xf]  ;;  %v850_v32 = vld [vmem:[%s2336_s4 + $0x28] sm:$0xf]  ;;  %v851_v33 = vld [vmem:[%s2336_s4 + $0x2c] sm:$0xf]  ;;  %v2164_v56 = vsub.s32 %v533_v52, %v535_v53 }
  0x28   : > { %1702 = vmatprep.mubr.msk.f32.mxu0 %vm380_vm1, %v374_v12  ;;  %588 = vperm.xlu1 %1809, %v523_v14   ;;  %v852_v34 = vld [vmem:[%s2336_s4 + $0x30] sm:$0xf]  ;;  %v853_v35 = vld [vmem:[%s2336_s4 + $0x34] sm:$0xf]  ;;  %v854_v36 = vld [vmem:[%s2336_s4 + $0x38] sm:$0xf] }
  0x29   : > { %v855_v37 = vld [vmem:[%s2336_s4 + $0x3c] sm:$0xf]  ;;  %v1213_v38 = vld [vmem:[%s2338_s6] sm:$0xf]  ;;  %v1214_v39 = vld [vmem:[%s2338_s6 + $0x4] sm:$0xf] }
  0x2a   : > { %v1215_v40 = vld [vmem:[%s2338_s6 + $0x8] sm:$0xf]  ;;  %v1216_v41 = vld [vmem:[%s2338_s6 + $0xc] sm:$0xf]  ;;  %v1217_v42 = vld [vmem:[%s2338_s6 + $0x10] sm:$0xf] }
  0x2b   : > { %1703 = vmatmul.mubr.msk.f32.gmra.mrb[2].mxu0 %vm380_vm1, %v375_v15  ;;  %600 = vperm.xlu0 %1808, %v524_v17   ;;  %v1218_v43 = vld [vmem:[%s2338_s6 + $0x14] sm:$0xf]  ;;  %v1219_v44 = vld [vmem:[%s2338_s6 + $0x18] sm:$0xf]  ;;  %v1220_v45 = vld [vmem:[%s2338_s6 + $0x1c] sm:$0xf] }
  0x2c   : > { %1705 = vmatprep.mubr.msk.f32.mxu0 %vm380_vm1, %v376_v16  ;;  %612 = vperm.xlu1 %1809, %v525_v20   ;;  %v2151_v46 = vld [vmem:[%s2339_s7 + $0x8] sm:$0xff]  ;;  %v2157_v47 = vld [vmem:[%s2339_s7 + $0x20] sm:$0xff]  ;;  %s1658_s21 = sshll.u32 %s1603_s13, 6  ;;  %s368_s22 = scalar_lea.vmem [#allocation3], %s1611_s17  ;;  %vm1522_vm7 = vcmask 1042432  }
  0x2d   : > { %v1821_v48 = vld [vmem:[%s2335_s3] sm:$0xff]   ;;  %s1539_s23 = sshll.u32 %s368_s22, 4  ;;  %s2288_s26 = scalar_lea.hbm %s2341_s9, %s1658_s21  ;;  %s2290_s23 = int_to_ptr.vmem [resolvable:$true] %s1539_s23 }
  0x2e   : > { %1719 = vmatprep.mubr.msk.bf16.mxu1 %vm710_vm4, %v1821_v48  ;;  %v1357_v48 = vld [vmem:[%s2340_s8] sm:$0x3]  ;;  %s1526_s27 = scalar_lea.sflag [#allocation4], %s2015_s28  ;;  %s1839_s29 = scalar_lea.vmem %s2290_s23, 64 }
  0x2f   : > { %1706 = vmatmul.mubr.msk.f32.gmra.mrb[4].mxu0 %vm380_vm1, %v377_v18  ;;  %858 = vperm.xlu0 %1808, %v840_v21   ;;  %p1840_p13 = scmp.ne.s32.totalorder %s2290_s23, %s1839_s29  ;;  %s1907_s13 = smov [#allocation3]  }
  0x30   : > { %1708 = vmatprep.mubr.msk.f32.mxu0 %vm380_vm1, %v378_v19  ;;  %870 = vperm.xlu1 %1809, %v841_v22   ;;  %s1843_s14 = sshll.u32 %s1907_s13, 4  ;;  %s1844_s14 = int_to_ptr.vmem [resolvable:$false] %s1843_s14 }
  0x31   : > { %p1841_p0 = pnand %p1840_p13, %p1996_p6  ;;  %s1845_s16 = scalar_lea.vmem %s1844_s14, 128 }
  0x32   : > { %p1846_p2 = scmp.lt.s32.totalorder %s2290_s23, %s1844_s14  ;;  %p1847_p3 = scmp.lt.s32.totalorder %s1845_s16, %s1839_s29 }
  0x33   : > { %1709 = vmatmul.mubr.msk.f32.gmra.mrb[6].mxu0 %vm380_vm1, %v379_v23  ;;  %882 = vperm.xlu0 %1808, %v842_v24   ;;  %p1842_p1 = pneg %p1841_p0 }
  0x34   : > { %894 = vperm.xlu1 %1809, %v843_v25   ;;  %p1848_p4 = por %p1847_p3, %p1846_p2 }
  0x36   : > { %p1849_p5 = pnand %p1848_p4, %p1842_p1 }
  0x37   : > { %906 = vperm.xlu0 %1808, %v844_v26  }
  0x38   : > { %918 = vperm.xlu1 %1809, %v845_v27  }
  0x3b   : > { %930 = vperm.xlu0 %1808, %v846_v28  }
  0x3c   : > { %942 = vperm.xlu1 %1809, %v847_v29  }
  0x3f   : > { %954 = vperm.xlu0 %1808, %v848_v30  }
  0x40   : > { %966 = vperm.xlu1 %1809, %v849_v31  }
  0x43   : > { %978 = vperm.xlu0 %1808, %v850_v32   ;;  %v1822_v32 = vld [vmem:[%s2335_s3 + $0x8] sm:$0xff]  }
  0x44   : > { %990 = vperm.xlu1 %1809, %v851_v33   ;;  %v1823_v33 = vld [vmem:[%s2335_s3 + $0x10] sm:$0xff]  }
  0x47   : > { %1002 = vperm.xlu0 %1808, %v852_v34   ;;  %v1824_v34 = vld [vmem:[%s2335_s3 + $0x18] sm:$0xff]  }
  0x48   : > { %1014 = vperm.xlu1 %1809, %v853_v35   ;;  %v1825_v35 = vld [vmem:[%s2335_s3 + $0x20] sm:$0xff]  }
  0x4b   : > { %1026 = vperm.xlu0 %1808, %v854_v36   ;;  %v1826_v36 = vld [vmem:[%s2335_s3 + $0x28] sm:$0xff]  }
  0x4c   : > { %1038 = vperm.xlu1 %1809, %v855_v37   ;;  %v1827_v37 = vld [vmem:[%s2335_s3 + $0x30] sm:$0xff]  }
  0x4f   : > { %1223 = vperm.xlu0 %1808, %v1213_v38   ;;  %v1828_v38 = vld [vmem:[%s2335_s3 + $0x38] sm:$0xff]  }
  0x50   : > { %1235 = vperm.xlu1 %1809, %v1214_v39   ;;  %v1829_v39 = vld [vmem:[%s2337_s5] sm:$0xff]  }
  0x51   : > { %1751 = vmatprep.mubr.bf16.mxu0 %v1829_v39 }
  0x53   : > { %1247 = vperm.xlu0 %1808, %v1215_v40   ;;  %v1906_v40 = vmov 1  }
  0x54   : > { %1259 = vperm.xlu1 %1809, %v1216_v41   ;;  %v1349_v41 = vld [vmem:[%s2339_s7] sm:$0xff] }
  0x57   : > { %1271 = vperm.xlu0 %1808, %v1217_v42   ;;  %v1352_v42 = vld [vmem:[%s2339_s7 + $0x18] sm:$0xff] }
  0x58   : > { %1283 = vperm.xlu1 %1809, %v1218_v43   ;;  %v1355_v43 = vld [vmem:[%s2339_s7 + $0x30] sm:$0xff] }
  0x5b   : > { %1295 = vperm.xlu0 %1808, %v1219_v44   ;;  %v1351_v44 = vld [vmem:[%s2339_s7 + $0x10] sm:$0xff] }
  0x5c   : > { %1307 = vperm.xlu1 %1809, %v1220_v45   ;;  %v1356_v45 = vld [vmem:[%s2339_s7 + $0x38] sm:$0xff] }
  0x5f   : > { %1373 = vperm.xlu0 %1808, %v2151_v46  }
  0x60   : > { %1810 = vset.pattern.permute.xlu1 %v1906_v40 }
  0x61   : > { %1438 = vperm.xlu1 %1810, %v2151_v46   ;;  %v1354_v46 = vld [vmem:[%s2339_s7 + $0x28] sm:$0xff] }
  0x63   : > { %1388 = vperm.xlu0 %1808, %v2157_v47  }
  0x65   : > { %1811 = vset.pattern.permute.xlu1 %v1903_v3 }
  0x66   : > { %1368 = vperm.xlu1 %1811, %v1349_v41  }
  0x67   : > { %1815 = vset.pattern.permute.xlu0 %v1906_v40 }
  0x68   : > { %1434 = vperm.xlu0 %1815, %v1349_v41  }
  0x6a   : > { %1812 = vset.pattern.permute.xlu1 %v1906_v40 }
  0x6b   : > { %1442 = vperm.xlu1 %1812, %v1351_v44  }
  0x6c   : > { %1446 = vperm.xlu0 %1815, %v1352_v42  }
  0x6f   : > { %1813 = vset.pattern.permute.xlu1 %v1903_v3 }
  0x70   : > { %1458 = vperm.xlu0 %1815, %v1355_v43   ;;  %1378 = vperm.xlu1 %1813, %v1351_v44  }
  0x74   : > { %1818 = vset.pattern.permute.xlu0 %v1903_v3  ;;  %1383 = vperm.xlu1 %1813, %v1352_v42  }
  0x75   : > { %1403 = vperm.xlu0 %1818, %v1356_v45  }
  0x78   : > { %1814 = vset.pattern.permute.xlu1 %v1906_v40 }
  0x79   : > { %1820 = vset.pattern.permute.xlu0 %v1906_v40  ;;  %1450 = vperm.xlu1 %1814, %v2157_v47  }
  0x7d   : > { %1454 = vperm.xlu1 %1814, %v1354_v46  }
  0x81   : > { %1816 = vset.pattern.permute.xlu1 %v1903_v3 }
  0x82   : > { %1393 = vperm.xlu1 %1816, %v1354_v46  }
  0x86   : > { %1398 = vperm.xlu1 %1816, %v1355_v43  }
  0x8a   : > { %1817 = vset.pattern.permute.xlu1 %v1906_v40 }
  0x8b   : > { %1462 = vperm.xlu1 %1817, %v1356_v45  }
  0x8f   : > { %1819 = vset.pattern.permute.xlu1 %v1903_v3 }
  0x90   : > { %1429 = vperm.xlu1 %1819, %v1357_v48  }
  0x9e   : > { %v529_v54 = vpop.permute.xlu0 %528 }
  0x9f   : > { %v553_v55 = vpop.permute.xlu1 %552  ;;  %v537_v59 = vrot.slane %v529_v54, %v2164_v56 }
  0xa0   : > { %v561_v0 = vrot.slane %v553_v55, %v2164_v56 }
  0xa2   : > { %v541_v57 = vpop.permute.xlu0 %540 }
  0xa3   : > { %v565_v58 = vpop.permute.xlu1 %564  ;;  %v549_v60 = vrot.slane %v541_v57, %v2164_v56 }
  0xa4   : > { %v573_v2 = vrot.slane %v565_v58, %v2164_v56 }
  0xa5   : > { %v1621_v63 = vcombine.low %v537_v59, %v549_v60 }
  0xa6   : > { %v577_v1 = vpop.permute.xlu0 %576  ;;  %v1622_v10 = vcombine.low %v561_v0, %v573_v2 }
  0xa7   : > { %v589_v5 = vpop.permute.xlu1 %588  ;;  %v585_v8 = vrot.slane %v577_v1, %v2164_v56 }
  0xa8   : > { %v597_v11 = vrot.slane %v589_v5, %v2164_v56 }
  0xaa   : > { %v601_v14 = vpop.permute.xlu0 %600  ;;  %v1623_v20 = vcombine.low %v585_v8, %v597_v11 }
  0xab   : > { %v609_v17 = vrot.slane %v601_v14, %v2164_v56  ;;  %v613_v18 = vpop.permute.xlu1 %612 }
  0xac   : > { %v621_v21 = vrot.slane %v613_v18, %v2164_v56 }
  0xae   : > { %v1624_v27 = vcombine.low %v609_v17, %v621_v21  ;;  %v859_v49 = vpop.permute.xlu0 %858 }
  0xaf   : > { %v871_v47 = vpop.permute.xlu1 %870  ;;  %v867_v59 = vrot.slane %v859_v49, %v2164_v56 }
  0xb0   : > { %v879_v60 = vrot.slane %v871_v47, %v2164_v56 }
  0xb2   : > { %v883_v50 = vpop.permute.xlu0 %882  ;;  %v1641_v5 = vcombine.low %v867_v59, %v879_v60 }
  0xb3   : > { %v895_v51 = vpop.permute.xlu1 %894  ;;  %v891_v57 = vrot.slane %v883_v50, %v2164_v56 }
  0xb4   : > { %v903_v58 = vrot.slane %v895_v51, %v2164_v56 }
  0xb6   : > { %v907_v52 = vpop.permute.xlu0 %906  ;;  %v1642_v0 = vcombine.low %v891_v57, %v903_v58 }
  0xb7   : > { %v919_v53 = vpop.permute.xlu1 %918 }
  0xba   : > { %v931_v54 = vpop.permute.xlu0 %930 }
  0xbb   : > { %v943_v55 = vpop.permute.xlu1 %942 }
  0xbc   : > { %v951_v11 = vrot.slane %v943_v55, %v2164_v56 }
  0xbe   : > { %v955_v1 = vpop.permute.xlu0 %954 }
  0xfa   : > { %v1701_v61 = vpop.f32.mrb[0].mxu0 }
  0xfb   : > { %v475_v62 = vpop.f32.mrb[1].mxu0 }
  0xfc   : > { %v514_v4 = vpack.c.bf16 %v1701_v61, %v475_v62 }
  0xfe   : > { %v646_v6 = vadd.bf16 %v1621_v63, %v514_v4  ;;  %v1704_v7 = vpop.f32.mrb[2].mxu0 }
  0xff   : > { %v485_v9 = vpop.f32.mrb[3].mxu0 }
 0x100   : > { %v515_v12 = vpack.c.bf16 %v1704_v7, %v485_v9  ;;  %v650_v13 = vmax.bf16 %v1903_v3, %v646_v6  ;;  %v967_v6 = vpop.permute.xlu1 %966 }
 0x102   : > { %v647_v15 = vadd.bf16 %v1622_v10, %v515_v12  ;;  %v1707_v16 = vpop.f32.mrb[4].mxu0  ;;  %1711 = vmatprep.subr.bf16.mxu1 %v650_v13  ;;  %v939_v10 = vrot.slane %v931_v54, %v2164_v56  ;;  %v915_v12 = vrot.slane %v907_v52, %v2164_v56 }
 0x103   : > { %v495_v19 = vpop.f32.mrb[5].mxu0  ;;  %1712 = vmatpush3.bf16.msra.mxu1 %v650_v13  ;;  %v927_v13 = vrot.slane %v919_v53, %v2164_v56 }
 0x104   : > { %v516_v22 = vpack.c.bf16 %v1707_v16, %v495_v19  ;;  %v651_v23 = vmax.bf16 %v1903_v3, %v647_v15  ;;  %v979_v16 = vpop.permute.xlu0 %978  ;;  %v991_v18 = vpop.permute.xlu1 %990  ;;  %v1644_v21 = vcombine.low %v939_v10, %v951_v11 }
 0x106   : > { %v648_v24 = vadd.bf16 %v1623_v20, %v516_v22  ;;  %v1710_v25 = vpop.f32.mrb[6].mxu0  ;;  %1713 = vmatprep.subr.bf16.mxu1 %v651_v23 }
 0x107   : > { %v505_v26 = vpop.f32.mrb[7].mxu0  ;;  %1714 = vmatpush3.bf16.msra.mxu1 %v651_v23 }
 0x108   : > { %v517_v28 = vpack.c.bf16 %v1710_v25, %v505_v26  ;;  %v652_v29 = vmax.bf16 %v1903_v3, %v648_v24  ;;  %v1643_v24 = vcombine.low %v915_v12, %v927_v13 }
 0x10a   : > { %v649_v30 = vadd.bf16 %v1624_v27, %v517_v28  ;;  %1715 = vmatprep.subr.bf16.mxu1 %v652_v29  ;;  %v987_v28 = vrot.slane %v979_v16, %v2164_v56 }
 0x10b   : > { %1716 = vmatpush3.bf16.msra.mxu1 %v652_v29  ;;  %v1003_v29 = vpop.permute.xlu0 %1002 }
 0x10c   : > { %v653_v31 = vmax.bf16 %v1903_v3, %v649_v30  ;;  %v999_v30 = vrot.slane %v991_v18, %v2164_v56  ;;  %v1011_v50 = vrot.slane %v1003_v29, %v2164_v56 }
 0x10e   : > { %1717 = vmatprep.subr.bf16.mxu1 %v653_v31  ;;  %v1646_v39 = vcombine.low %v987_v28, %v999_v30 }
 0x10f   : > { %1718 = vmatpush3.bf16.msra.mxu1 %v653_v31  ;;  %v963_v31 = vrot.slane %v955_v1, %v2164_v56  ;;  %v1027_v45 = vpop.permute.xlu0 %1026 }
 0x110   : > { %v1035_v49 = vrot.slane %v1027_v45, %v2164_v56 }
 0x112   : > { %1720 = vmatmul.mubr.msk.bf16.vlgmr.msra.gmra.mrb[0].mxu1 %vm710_vm4, %v1822_v32  ;;  %v975_v32 = vrot.slane %v967_v6, %v2164_v56  ;;  %v1832_v6 = vld [vmem:[%s2337_s5 + $0x18] sm:$0xff]  }
 0x113   : > { %1723 = vmatprep.mubr.msk.bf16.mxu1 %vm710_vm4, %v1823_v33  ;;  %v1015_v33 = vpop.permute.xlu1 %1014  ;;  %v1224_v12 = vpop.permute.xlu0 %1223 }
 0x114   : > { %v1645_v42 = vcombine.low %v963_v31, %v975_v32  ;;  %v1023_v51 = vrot.slane %v1015_v33, %v2164_v56 }
 0x117   : > { %v1039_v46 = vpop.permute.xlu1 %1038 }
 0x118   : > { %v1047_v47 = vrot.slane %v1039_v46, %v2164_v56 }
 0x11a   : > { %1724 = vmatmul.mubr.msk.bf16.gmra.mrb[4].mxu1 %vm710_vm4, %v1824_v34  ;;  %v1648_v58 = vcombine.low %v1035_v49, %v1047_v47 }
 0x11b   : > { %1727 = vmatprep.mubr.msk.bf16.mxu1 %vm710_vm4, %v1825_v35 }
 0x122   : > { %1728 = vmatmul.mubr.msk.bf16.gmra.mrb[8].mxu1 %vm710_vm4, %v1826_v36 }
 0x123   : > { %1731 = vmatprep.mubr.msk.bf16.mxu1 %vm710_vm4, %v1827_v37 }
 0x12a   : > { %1732 = vmatmul.mubr.msk.bf16.gmra.mrb[12].mxu1 %vm710_vm4, %v1828_v38 }
 0x1e5   : > { %v1721_v61 = vpop.f32.mrb[0].mxu1 }
 0x1e6   : > { %v769_v62 = vpop.f32.mrb[1].mxu1 }
 0x1e7   : > { %v1722_v63 = vpop.f32.mrb[2].mxu1 }
 0x1e8   : > { %v833_v2 = vpack.c.bf16 %v1722_v63, %v1721_v61  ;;  %v772_v4 = vpop.f32.mrb[3].mxu1  ;;  %v1647_v61 = vcombine.low %v1011_v50, %v1023_v51 }
 0x1e9   : > { %v832_v7 = vpack.c.bf16 %v772_v4, %v769_v62  ;;  %v1830_v4 = vld [vmem:[%s2337_s5 + $0x8] sm:$0xff]  }
 0x1ea   : > { %v1097_v8 = vadd.bf16 %v1642_v0, %v833_v2 }
 0x1eb   : > { %v1096_v9 = vadd.bf16 %v1641_v5, %v832_v7  ;;  %v1831_v5 = vld [vmem:[%s2337_s5 + $0x10] sm:$0xff]   ;;  %v1236_v7 = vpop.permute.xlu1 %1235 }
 0x1ec   : > { %v1105_v20 = vmax.bf16 %v1903_v3, %v1097_v8 }
 0x1ed   : > { %v1725_v14 = vpop.f32.mrb[4].mxu1  ;;  %v1104_v15 = vmax.bf16 %v1903_v3, %v1096_v9 }
 0x1ee   : > { %v785_v17 = vpop.f32.mrb[5].mxu1 }
 0x1ef   : > { %v1726_v19 = vpop.f32.mrb[6].mxu1  ;;  %1735 = vmatprep.subr.bf16.mxu0 %v1104_v15  ;;  %v1260_v8 = vpop.permute.xlu1 %1259 }
 0x1f0   : > { %v835_v22 = vpack.c.bf16 %v1726_v19, %v1725_v14  ;;  %v788_v23 = vpop.f32.mrb[7].mxu1  ;;  %1736 = vmatpush3.bf16.msra.mxu0 %v1104_v15  ;;  %v1248_v14 = vpop.permute.xlu0 %1247 }
 0x1f1   : > { %v834_v25 = vpack.c.bf16 %v788_v23, %v785_v17  ;;  %1737 = vmatprep.subr.bf16.mxu0 %v1105_v20  ;;  %v1232_v23 = vrot.slane %v1224_v12, %v2164_v56 }
 0x1f2   : > { %v1099_v26 = vadd.bf16 %v1644_v21, %v835_v22  ;;  %v1256_v21 = vrot.slane %v1248_v14, %v2164_v56  ;;  %v1268_v22 = vrot.slane %v1260_v8, %v2164_v56 }
 0x1f3   : > { %v1098_v27 = vadd.bf16 %v1643_v24, %v834_v25  ;;  %v1284_v9 = vpop.permute.xlu1 %1283  ;;  %v1244_v24 = vrot.slane %v1236_v7, %v2164_v56 }
 0x1f4   : > { %1738 = vmatpush3.bf16.msra.mxu0 %v1105_v20  ;;  %v1107_v38 = vmax.bf16 %v1903_v3, %v1099_v26  ;;  %v1272_v16 = vpop.permute.xlu0 %1271  ;;  %v1654_v30 = vcombine.low %v1256_v21, %v1268_v22 }
 0x1f5   : > { %v1729_v34 = vpop.f32.mrb[8].mxu1  ;;  %v1106_v35 = vmax.bf16 %v1903_v3, %v1098_v27  ;;  %v1653_v33 = vcombine.low %v1232_v23, %v1244_v24 }
 0x1f6   : > { %v801_v36 = vpop.f32.mrb[9].mxu1 }
 0x1f7   : > { %v1730_v37 = vpop.f32.mrb[10].mxu1  ;;  %1739 = vmatprep.subr.bf16.mxu0 %v1106_v35  ;;  %v1308_v10 = vpop.permute.xlu1 %1307 }
 0x1f8   : > { %v837_v40 = vpack.c.bf16 %v1730_v37, %v1729_v34  ;;  %v804_v41 = vpop.f32.mrb[11].mxu1  ;;  %1740 = vmatpush3.bf16.msra.mxu0 %v1106_v35  ;;  %v1296_v18 = vpop.permute.xlu0 %1295  ;;  %v1316_v45 = vrot.slane %v1308_v10, %v2164_v56 }
 0x1f9   : > { %v836_v43 = vpack.c.bf16 %v804_v41, %v801_v36  ;;  %1741 = vmatprep.subr.bf16.mxu0 %v1107_v38 }
 0x1fa   : > { %v1101_v44 = vadd.bf16 %v1646_v39, %v837_v40 }
 0x1fb   : > { %v1100_v48 = vadd.bf16 %v1645_v42, %v836_v43  ;;  %v1439_v11 = vpop.permute.xlu1 %1438  ;;  %v1280_v42 = vrot.slane %v1272_v16, %v2164_v56  ;;  %v1304_v43 = vrot.slane %v1296_v18, %v2164_v56 }
 0x1fc   : > { %1742 = vmatpush3.bf16.msra.mxu0 %v1107_v38  ;;  %v1109_v57 = vmax.bf16 %v1903_v3, %v1101_v44  ;;  %v1374_v20 = vpop.permute.xlu0 %1373  ;;  %v1292_v44 = vrot.slane %v1284_v9, %v2164_v56 }
 0x1fd   : > { %v1733_v52 = vpop.f32.mrb[12].mxu1  ;;  %v1108_v53 = vmax.bf16 %v1903_v3, %v1100_v48 }
 0x1fe   : > { %v817_v54 = vpop.f32.mrb[13].mxu1 }
 0x1ff   : > { %v1734_v55 = vpop.f32.mrb[14].mxu1  ;;  %1743 = vmatprep.subr.bf16.mxu0 %v1108_v53  ;;  %v1369_v13 = vpop.permute.xlu1 %1368 }
 0x200   : > { %v839_v59 = vpack.c.bf16 %v1734_v55, %v1733_v52  ;;  %v820_v60 = vpop.f32.mrb[15].mxu1  ;;  %1744 = vmatpush3.bf16.msra.mxu0 %v1108_v53  ;;  %v1389_v28 = vpop.permute.xlu0 %1388 }
 0x201   : > { %v838_v62 = vpack.c.bf16 %v820_v60, %v817_v54  ;;  %1745 = vmatprep.subr.bf16.mxu0 %v1109_v57  ;;  %v1655_v60 = vcombine.low %v1280_v42, %v1292_v44 }
 0x202   : > { %v1103_v63 = vadd.bf16 %v1648_v58, %v839_v59 }
 0x203   : > { %v1102_v0 = vadd.bf16 %v1647_v61, %v838_v62  ;;  %v1443_v15 = vpop.permute.xlu1 %1442  ;;  %v1656_v61 = vcombine.low %v1304_v43, %v1316_v45 }
 0x204   : > { %1746 = vmatpush3.bf16.msra.mxu0 %v1109_v57  ;;  %v1111_v2 = vmax.bf16 %v1903_v3, %v1103_v63  ;;  %v1435_v37 = vpop.permute.xlu0 %1434 }
 0x205   : > { %v1110_v1 = vmax.bf16 %v1903_v3, %v1102_v0 }
 0x207   : > { %1747 = vmatprep.subr.bf16.mxu0 %v1110_v1  ;;  %v1379_v17 = vpop.permute.xlu1 %1378 }
 0x208   : > { %1748 = vmatpush3.bf16.msra.mxu0 %v1110_v1  ;;  %v1447_v58 = vpop.permute.xlu0 %1446 }
 0x209   : > { %1749 = vmatprep.subr.bf16.mxu0 %v1111_v2 }
 0x20b   : > { %v1384_v19 = vpop.permute.xlu1 %1383 }
 0x20c   : > { %1750 = vmatpush3.bf16.msra.mxu0 %v1111_v2  ;;  %v1459_v14 = vpop.permute.xlu0 %1458 }
 0x20f   : > { %1752 = vmatmul.mubr.bf16.vlgmr.msra.gmra.mrb[8].mxu0 %v1830_v4  ;;  %v1451_v26 = vpop.permute.xlu1 %1450 }
 0x210   : > { %1755 = vmatprep.mubr.bf16.mxu0 %v1831_v5 }
 0x213   : > { %v1455_v38 = vpop.permute.xlu1 %1454 }
 0x217   : > { %1756 = vmatmul.mubr.bf16.gmra.mrb[12].mxu0 %v1832_v6  ;;  %v1394_v59 = vpop.permute.xlu1 %1393 }
 0x21b   : > { %v1399_v16 = vpop.permute.xlu1 %1398 }
 0x2e2   : > { %v1753_v25 = vpop.f32.mrb[8].mxu0 }
 0x2e3   : > { %v1178_v27 = vpop.f32.mrb[9].mxu0 }
 0x2e4   : > { %v1754_v29 = vpop.f32.mrb[10].mxu0 }
 0x2e5   : > { %v1210_v31 = vpack.c.bf16 %v1754_v29, %v1753_v25  ;;  %v1181_v32 = vpop.f32.mrb[11].mxu0  ;;  %v1404_v29 = vpop.permute.xlu0 %1403 }
 0x2e6   : > { %v1209_v34 = vpack.c.bf16 %v1181_v32, %v1178_v27  ;;  %v1463_v27 = vpop.permute.xlu1 %1462 }
 0x2e7   : > { %v1342_v35 = vadd.bf16 %v1654_v30, %v1210_v31 }
 0x2e8   : > { %v1341_v36 = vadd.bf16 %v1653_v33, %v1209_v34 }
 0x2e9   : > { %v1346_v39 = vmax.bf16 %v1903_v3, %v1342_v35 }
 0x2ea   : > { %v1345_v40 = vmax.bf16 %v1903_v3, %v1341_v36  ;;  %v1757_v41 = vpop.f32.mrb[12].mxu0 }
 0x2eb   : > { %v1194_v46 = vpop.f32.mrb[13].mxu0  ;;  %v1360_v47 = vunpack.c.l.bf16 %v1346_v39  ;;  %v1361_v51 = vunpack.c.h.bf16 %v1346_v39 }
 0x2ec   : > { %v1358_v48 = vunpack.c.l.bf16 %v1345_v40  ;;  %v1359_v49 = vunpack.c.h.bf16 %v1345_v40  ;;  %v1758_v50 = vpop.f32.mrb[14].mxu0 }
 0x2ed   : > { %v1197_v52 = vpop.f32.mrb[15].mxu0  ;;  %v1212_v62 = vpack.c.bf16 %v1758_v50, %v1757_v41  ;;  %v1408_v56 = vmul.f32 %v1379_v17, %v1360_v47  ;;  %v1467_v2 = vmul.f32 %v1443_v15, %v1360_v47  ;;  %v1409_v6 = vmul.f32 %v1384_v19, %v1361_v51 }
 0x2ee   : > { %v1406_v53 = vmul.f32 %v1369_v13, %v1358_v48  ;;  %v1407_v54 = vmul.f32 %v1374_v20, %v1359_v49  ;;  %v1465_v55 = vmul.f32 %v1435_v37, %v1358_v48  ;;  %v1466_v57 = vmul.f32 %v1439_v11, %v1359_v49  ;;  %v1430_v48 = vpop.permute.xlu1 %1429 }
 0x2ef   : > { %v1211_v63 = vpack.c.bf16 %v1197_v52, %v1194_v46  ;;  %v1344_v4 = vadd.bf16 %v1656_v61, %v1212_v62  ;;  %v1468_v8 = vmul.f32 %v1447_v58, %v1361_v51 }
 0x2f0   : > { %v1414_v0 = vadd.f32 %v1407_v54, %v1406_v53  ;;  %v1473_v1 = vadd.f32 %v1466_v57, %v1465_v55 }
 0x2f1   : > { %v1343_v5 = vadd.bf16 %v1655_v60, %v1211_v63  ;;  %v1348_v11 = vmax.bf16 %v1903_v3, %v1344_v4 }
 0x2f2   : > { %v1415_v7 = vadd.f32 %v1414_v0, %v1408_v56  ;;  %v1474_v9 = vadd.f32 %v1473_v1, %v1467_v2 }
 0x2f3   : > { %v1347_v10 = vmax.bf16 %v1903_v3, %v1343_v5  ;;  %v1364_v21 = vunpack.c.l.bf16 %v1348_v11  ;;  %v1365_v15 = vunpack.c.h.bf16 %v1348_v11 }
 0x2f4   : > { %v1416_v12 = vadd.f32 %v1415_v7, %v1409_v6  ;;  %v1475_v13 = vadd.f32 %v1474_v9, %v1468_v8 }
 0x2f5   : > { %v1362_v18 = vunpack.c.l.bf16 %v1347_v10  ;;  %v1363_v20 = vunpack.c.h.bf16 %v1347_v10  ;;  %v1471_v30 = vmul.f32 %v1459_v14, %v1364_v21  ;;  %v1412_v32 = vmul.f32 %v1399_v16, %v1364_v21 }
 0x2f6   : > { %v1472_v35 = vmul.f32 %v1463_v27, %v1365_v15  ;;  %v1413_v36 = vmul.f32 %v1404_v29, %v1365_v15 }
 0x2f7   : > { %v1469_v22 = vmul.f32 %v1451_v26, %v1362_v18  ;;  %v1410_v17 = vmul.f32 %v1389_v28, %v1362_v18  ;;  %v1470_v23 = vmul.f32 %v1455_v38, %v1363_v20  ;;  %v1411_v19 = vmul.f32 %v1394_v59, %v1363_v20 }
 0x2f9   : > { %v1476_v24 = vadd.f32 %v1475_v13, %v1469_v22  ;;  %v1417_v25 = vadd.f32 %v1416_v12, %v1410_v17 }
 0x2fb   : > { %v1477_v31 = vadd.f32 %v1476_v24, %v1470_v23  ;;  %v1418_v3 = vadd.f32 %v1417_v25, %v1411_v19 }
 0x2fd   : > { %v1478_v33 = vadd.f32 %v1477_v31, %v1471_v30  ;;  %v1419_v34 = vadd.f32 %v1418_v3, %v1412_v32 }
 0x2ff   : > { %v1479_v37 = vadd.f32 %v1478_v33, %v1472_v35  ;;  %v1420_v39 = vadd.f32 %v1419_v34, %v1413_v36 }
 0x301   : > { %v1480_v40 = vrot.slane %v1479_v37, 4  ;;  %v1421_v26 = vrot.slane %v1420_v39, 4 }
 0x303   : > { %v1481_v28 = vadd.f32 %v1480_v40, %v1479_v37  ;;  %v1422_v41 = vadd.f32 %v1421_v26, %v1420_v39 }
 0x305   : > { %v1423_v38 = vrot.slane %v1422_v41, 2  ;;  %v1482_v42 = vrot.slane %v1481_v28, 2 }
 0x307   : > { %v1424_v43 = vadd.f32 %v1423_v38, %v1422_v41  ;;  %v1483_v44 = vadd.f32 %v1482_v42, %v1481_v28 }
 0x309   : > { %v1425_v45 = vrot.slane %v1424_v43, 1  ;;  %v1484_v46 = vrot.slane %v1483_v44, 1 }
 0x30b   : > { %v1426_v49 = vadd.f32 %v1425_v45, %v1424_v43  ;;  %v1485_v47 = vadd.f32 %v1484_v46, %v1483_v44 }
 0x30d   : > { %v1432_v50 = vadd.f32 %v1430_v48, %v1426_v49  ;;  %v1486_v51 = vadd.f32 %v1485_v47, %v1430_v48 }
 0x30f   : > { %v1488_v52 = vrot.slane %v1486_v51, 1  ;;  %v1519_v53 = vsel %vm1518_vm5, %v1432_v50, %v1486_v51 }
 0x311   : > { %v1490_v54 = vmax.f32 %v1432_v50, %v1488_v52 }
 0x313   : > { %v1491_v55 = vsub.f32 %v1432_v50, %v1490_v54  ;;  %v1495_v57 = vrot.slane %v1490_v54, 7 }
 0x315   : > { %v1497_v58 = vsub.f32 %v1486_v51, %v1495_v57  ;;  %v1492_v59 = vmul.f32 1.442695, %v1491_v55 }
 0x317   : > { %v1498_v60 = vmul.f32 1.442695, %v1497_v58 }
 0x319   : > { %1833 = vpow2.f32 %v1498_v60 }
 0x31a   : > { %1835 = vpow2.f32 %v1492_v59 }
 0x323   : > { %v1834_v61 = vpop.eup %1833 }
 0x324   : > { %v1501_v62 = vrot.slane %v1834_v61, 1  ;;  %v1836_v63 = vpop.eup %1835 }
 0x326   : > { %v1503_v0 = vadd.f32 %v1836_v63, %v1501_v62 }
 0x328   : > { %1837 = vlog2.f32 %v1503_v0 }
 0x332   : > { %v1838_v1 = vpop.eup %1837 }
 0x333   : > { %v1505_v56 = vmul.f32 0.6931472, %v1838_v1 }
 0x335   : > { %v1506_v2 = vadd.f32 %v1505_v56, %v1490_v54 }
 0x337   : > { %v1507_v4 = vsub.f32 %v1432_v50, %v1506_v2  ;;  %v1509_v5 = vrot.slane %v1506_v2, 7 }
 0x339   : > { %v1511_v6 = vsub.f32 %v1486_v51, %v1509_v5  ;;  %v1513_v7 = vrot.slane %v1507_v4, 6 }
 0x33b   : > { %v1516_v8 = vrot.slane %v1511_v6, 6  ;;  %v1521_v9 = vsel %vm1520_vm6, %v1519_v53, %v1513_v7 }
 0x33d   : > { %v1523_v10 = vsel %vm1522_vm7, %v1521_v9, %v1516_v8 }
 0x33e   : > { %1524 = vst [vmem:[%s368_s22] sm:$0xf] %v1523_v10 }
 0x33f   : > { %1852 = shalt.err (!%p1849_p5)
}
 0x340   : > { %s1853_s28 = scalar_lea.hbm %s2288_s26, 64  ;;  %s1857_s22 = scalar_lea.hbm %s2341_s9, 128 }
 0x341   : > { %p1854_p7 = scmp.ne.s32.totalorder %s2288_s26, %s1853_s28  ;;  %p1858_p12 = scmp.lt.u32.totalorder %s2288_s26, %s2341_s9 }
 0x342   : > { %p1859_p13 = scmp.lt.u32.totalorder %s1857_s22, %s1853_s28  ;;  %p1861_p1 = scmp.lt.u32.totalorder %s1853_s28, %s2288_s26 }
 0x343   : > { %p1855_p10 = pnand %p1854_p7, %p1996_p6 }
 0x344   : > { %p1860_p0 = por %p1859_p13, %p1858_p12 }
 0x345   : > { %p1856_p11 = pneg %p1855_p10 }
 0x346   : > { %p1862_p2 = por %p1861_p1, %p1860_p0 }
 0x348   : > { %p1863_p3 = pnand %p1862_p2, %p1856_p11 }
 0x34a   : > { %1866 = shalt.err (!%p1863_p3)
}
 0x34b   : > { %1765 = dma.vmem_to_hbm [thread:$0]  (%p1996_p6), %s2290_s23, 64, %s2288_s26, %s1526_s27  }
 0x34c PF: > { %s1551_s29 = sand.u32 1, %s1889_s30   ;;  %p1768_p4 = pnand %p1606_p9, %p2000_p8 }
 0x34d   : > { %s1552_s13 = scalar_lea.sflag [#allocation4], %s1551_s29 }
 0x34e   : > { %1884 = dma.done.wait (!%p1768_p4), %s1552_s13, 64  }
 0x34f   : > { %1886 = vsyncadd (!%p1768_p4), %s1552_s13, 4294967232  ;;  %p19_p5 = scmp.ge.s32.totalorder %s1981_s15, 4   ;;  %s2344_s30 = smov %s1893_s10 }
 0x350   : > { %s2345_s10 = smov %s1897_s11  ;;  %s2346_s11 = smov %s1994_s18 }
 0x351   : > { %s2347_s12 = smov %s1981_s15  ;;  %21 = sbr.rel (!%p19_p5) target bundleno = 3 (0x3), region = 134 }
 0x358   :  { %1557 = vsyncpa [#allocation4], 1 }
 0x359   :  { %1559 = vsyncpa [#allocation4 + $0x1], 1 }

</bundles_post_ra>
